<compile_context>
chip_gen: v6e
topology: v6e:2x2x1
jax: 0.10.0
libtpu: 0.0.40
codegen_flags: <defaults>
</compile_context>

<pallas_src>
import jax
import jax.numpy as jnp
import numpy as np
from jax.experimental import pallas as pl
from jax.experimental.pallas import tpu as pltpu


def _critic_kernel(x_ref, w1_ref, b1_ref, w2_ref, b2_ref, w3_ref, b3_ref, o_ref):
    """One batch tile; batch is on the lane axis throughout.

    x_ref : (in_dim, tile_b)   compute dtype (f32 or bf16)
    w1_ref: (hidden, in_dim)   compute dtype      b1_ref: (hidden, 1) f32
    w2_ref: (hidden, hidden)   compute dtype      b2_ref: (hidden, 1) f32
    w3_ref: (hidden, 1)        f32                b3_ref: (1, 1)      f32
    o_ref : (1, tile_b)        f32  (lane-dense critic values for this tile)
    """
    cdt = w1_ref.dtype  # MXU input dtype

    # fc1: (hidden, in) @ (in, tile_b) -> (hidden, tile_b), f32 accumulation.
    h1 = jnp.dot(w1_ref[...], x_ref[...], preferred_element_type=jnp.float32)
    h1 = jnp.maximum(h1 + b1_ref[...], 0.0)          # bias + ReLU in f32 (VPU)

    # fc2: (hidden, hidden) @ (hidden, tile_b) -> (hidden, tile_b)
    h2 = jnp.dot(w2_ref[...], h1.astype(cdt), preferred_element_type=jnp.float32)
    h2 = jnp.maximum(h2 + b2_ref[...], 0.0)

    # critic_head (N=1): skip the MXU — VPU multiply + cross-sublane (XLU)
    # reduce gives the lane-dense (1, tile_b) result directly.
    w3 = w3_ref[...].astype(jnp.float32)              # (hidden, 1)
    vals = jnp.sum(h2 * w3, axis=0, keepdims=True) + b3_ref[...]
    o_ref[...] = vals.astype(o_ref.dtype)


def critic_forward(state, params, *, tile_b=512, compute_dtype=jnp.float32):
    """state: (B, input_dim) f32; params in torch layout (W: (out,in), b: (out,)).
    Returns (B, 1) f32 — same forward semantics as Critic.forward."""
    B, in_dim = state.shape
    hidden = params["w1"].shape[0]

    # Batch goes on the lane axis: 128-aligned tile, batch padded up to it.
    tile_b = max(128, (int(tile_b) // 128) * 128)
    tile_b = min(tile_b, pl.cdiv(B, 128) * 128)
    b_pad = pl.cdiv(B, tile_b) * tile_b
    grid = (b_pad // tile_b,)

    # Wrapper-side layout plumbing: pad batch, transpose, cast for the MXU.
    x_t = jnp.pad(state, ((0, b_pad - B), (0, 0))).T.astype(compute_dtype)

    w1 = params["w1"].astype(compute_dtype)                     # (hidden, in)
    w2 = params["w2"].astype(compute_dtype)                     # (hidden, hidden)
    b1 = params["b1"].reshape(hidden, 1).astype(jnp.float32)
    b2 = params["b2"].reshape(hidden, 1).astype(jnp.float32)
    w3 = params["w3"].reshape(hidden, 1).astype(jnp.float32)    # head stays f32 (VPU)
    b3 = params["b3"].reshape(1, 1).astype(jnp.float32)

    # Weights/biases: full-array blocks, constant index_map -> VMEM-resident
    # across all grid steps (fetched once).
    resident = lambda a: pl.BlockSpec(a.shape, lambda i: (0, 0))

    out = pl.pallas_call(
        _critic_kernel,
        out_shape=jax.ShapeDtypeStruct((1, b_pad), jnp.float32),
        grid=grid,
        in_specs=[
            pl.BlockSpec((in_dim, tile_b), lambda i: (0, i)),   # streamed batch tile
            resident(w1), resident(b1),
            resident(w2), resident(b2),
            resident(w3), resident(b3),
        ],
        out_specs=pl.BlockSpec((1, tile_b), lambda i: (0, i)),  # lane-dense output
        compiler_params=pltpu.CompilerParams(
            dimension_semantics=("parallel",)),  # v7x: batch tiles across 2 TCs
    )(x_t, w1, b1, w2, b2, w3, b3)

    return out[0, :B].reshape(B, 1)


# ---------------------------------------------------------------------------
# Parameter init (matches torch: xavier_uniform_ weights, zero biases) and a
# pure-JAX reference for correctness checks.
# ---------------------------------------------------------------------------
def xavier_uniform(key, out_features, in_features):
    bound = float(np.sqrt(6.0 / (in_features + out_features)))
    return jax.random.uniform(key, (out_features, in_features),
                              dtype=jnp.float32, minval=-bound, maxval=bound)


def init_critic_params(key, input_dim, hidden_dim):
    k1, k2, k3 = jax.random.split(key, 3)
    return {
        "w1": xavier_uniform(k1, hidden_dim, input_dim),
        "b1": jnp.zeros((hidden_dim,), jnp.float32),
        "w2": xavier_uniform(k2, hidden_dim, hidden_dim),
        "b2": jnp.zeros((hidden_dim,), jnp.float32),
        "w3": xavier_uniform(k3, 1, hidden_dim),
        "b3": jnp.zeros((1,), jnp.float32),
    }


def critic_reference(state, p, compute_dtype=jnp.float32):
    cd = compute_dtype
    x = state.astype(cd)
    h1 = jnp.maximum(
        jnp.dot(x, p["w1"].astype(cd).T, preferred_element_type=jnp.float32)
        + p["b1"], 0.0)
    h2 = jnp.maximum(
        jnp.dot(h1.astype(cd), p["w2"].astype(cd).T,
                preferred_element_type=jnp.float32) + p["b2"], 0.0)
    return jnp.dot(h2, p["w3"].T, preferred_element_type=jnp.float32) + p["b3"]


if __name__ == "__main__":
    key = jax.random.PRNGKey(0)
    k_state, k_params, k_big = jax.random.split(key, 3)

    input_dim, hidden_dim = 4, 32   # CartPole-like critic

    params = init_critic_params(k_params, input_dim, hidden_dim)

    # 1) Small batch, f32 — exact semantics of the torch module.
    state = jax.random.normal(k_state, (2, input_dim), dtype=jnp.float32)
    out = jax.block_until_ready(critic_forward(state, params))
    ref = critic_reference(state, params)
    np.testing.assert_allclose(np.asarray(out), np.asarray(ref),
                               rtol=1e-5, atol=1e-5)
    assert out.shape == (2, 1)

    # 2) Large batch streamed through the tiled/pipelined grid with bf16
    #    weights & activations (f32 accumulation).
    big_state = jax.random.normal(k_big, (4096, input_dim), dtype=jnp.float32)
    out_big = jax.block_until_ready(
        critic_forward(big_state, params, tile_b=512,
                       compute_dtype=jnp.bfloat16))
    ref_big = critic_reference(big_state, params, compute_dtype=jnp.bfloat16)
    np.testing.assert_allclose(np.asarray(out_big), np.asarray(ref_big),
                               rtol=2e-2, atol=2e-2)
    assert out_big.shape == (4096, 1)

    print("KERNEL_OK")
</pallas_src>

<mosaic_0001>
module attributes {stable_mosaic.version = 11 : i64} {
  func.func @_critic_kernel(%arg0: i32, %arg1: memref<4x128xf32, #tpu.memory_space<vmem>>, %arg2: memref<32x4xf32, #tpu.memory_space<vmem>>, %arg3: memref<32x1xf32, #tpu.memory_space<vmem>>, %arg4: memref<32x32xf32, #tpu.memory_space<vmem>>, %arg5: memref<32x1xf32, #tpu.memory_space<vmem>>, %arg6: memref<32x1xf32, #tpu.memory_space<vmem>>, %arg7: memref<1x1xf32, #tpu.memory_space<vmem>>, %arg8: memref<1x128xf32, #tpu.memory_space<vmem>>) attributes {dimension_semantics = [#tpu.dimension_semantics<parallel>], iteration_bounds = array<i64: 1>, scalar_prefetch = 0 : i64, scratch_operands = 0 : i64, tpu.core_type = #tpu.core_type<tc>, window_params = [{transform_indices = @transform_0, window_bounds = array<i64: 4, 128>}, {pipeline_mode = #tpu.pipeline_mode<synchronous>, transform_indices = @transform_1, window_bounds = array<i64: 32, 4>}, {pipeline_mode = #tpu.pipeline_mode<synchronous>, transform_indices = @transform_2, window_bounds = array<i64: 32, 1>}, {pipeline_mode = #tpu.pipeline_mode<synchronous>, transform_indices = @transform_3, window_bounds = array<i64: 32, 32>}, {pipeline_mode = #tpu.pipeline_mode<synchronous>, transform_indices = @transform_4, window_bounds = array<i64: 32, 1>}, {pipeline_mode = #tpu.pipeline_mode<synchronous>, transform_indices = @transform_5, window_bounds = array<i64: 32, 1>}, {pipeline_mode = #tpu.pipeline_mode<synchronous>, transform_indices = @transform_6, window_bounds = array<i64: 1, 1>}, {transform_indices = @transform_7, window_bounds = array<i64: 1, 128>}]} {
    %c0 = arith.constant 0 : index
    %c0_0 = arith.constant 0 : index
    %0 = vector.load %arg2[%c0, %c0_0] : memref<32x4xf32, #tpu.memory_space<vmem>>, vector<32x4xf32>
    %c0_1 = arith.constant 0 : index
    %c0_2 = arith.constant 0 : index
    %1 = vector.load %arg1[%c0_1, %c0_2] : memref<4x128xf32, #tpu.memory_space<vmem>>, vector<4x128xf32>
    %cst = arith.constant dense<0.000000e+00> : vector<32x128xf32>
    %2 = tpu.matmul %0, %1, %cst {dimension_numbers = #tpu.dot_dimension_numbers<[1], [0], [0], [1], [0, 0, 1, 1], [], []>} : vector<32x4xf32>, vector<4x128xf32>, vector<32x128xf32> -> vector<32x128xf32>
    %c0_3 = arith.constant 0 : index
    %c0_4 = arith.constant 0 : index
    %3 = vector.load %arg3[%c0_3, %c0_4] : memref<32x1xf32, #tpu.memory_space<vmem>>, vector<32x1xf32>
    %4 = vector.broadcast %3 : vector<32x1xf32> to vector<32x128xf32>
    %5 = arith.addf %2, %4 : vector<32x128xf32>
    %cst_5 = arith.constant 0.000000e+00 : f32
    %6 = vector.broadcast %cst_5 : f32 to vector<32x128xf32>
    %7 = arith.maximumf %5, %6 : vector<32x128xf32>
    %c0_6 = arith.constant 0 : index
    %c0_7 = arith.constant 0 : index
    %8 = vector.load %arg4[%c0_6, %c0_7] : memref<32x32xf32, #tpu.memory_space<vmem>>, vector<32x32xf32>
    %cst_8 = arith.constant dense<0.000000e+00> : vector<32x128xf32>
    %9 = tpu.matmul %8, %7, %cst_8 {dimension_numbers = #tpu.dot_dimension_numbers<[1], [0], [0], [1], [0, 0, 1, 1], [], []>} : vector<32x32xf32>, vector<32x128xf32>, vector<32x128xf32> -> vector<32x128xf32>
    %c0_9 = arith.constant 0 : index
    %c0_10 = arith.constant 0 : index
    %10 = vector.load %arg5[%c0_9, %c0_10] : memref<32x1xf32, #tpu.memory_space<vmem>>, vector<32x1xf32>
    %11 = vector.broadcast %10 : vector<32x1xf32> to vector<32x128xf32>
    %12 = arith.addf %9, %11 : vector<32x128xf32>
    %cst_11 = arith.constant 0.000000e+00 : f32
    %13 = vector.broadcast %cst_11 : f32 to vector<32x128xf32>
    %14 = arith.maximumf %12, %13 : vector<32x128xf32>
    %c0_12 = arith.constant 0 : index
    %c0_13 = arith.constant 0 : index
    %15 = vector.load %arg6[%c0_12, %c0_13] : memref<32x1xf32, #tpu.memory_space<vmem>>, vector<32x1xf32>
    %16 = vector.broadcast %15 : vector<32x1xf32> to vector<32x128xf32>
    %17 = arith.mulf %14, %16 : vector<32x128xf32>
    %cst_14 = arith.constant dense<0.000000e+00> : vector<128xf32>
    %18 = vector.multi_reduction <add>, %17, %cst_14 [0] : vector<32x128xf32> to vector<128xf32>
    %19 = vector.shape_cast %18 : vector<128xf32> to vector<1x128xf32>
    %c0_15 = arith.constant 0 : index
    %c0_16 = arith.constant 0 : index
    %20 = vector.load %arg7[%c0_15, %c0_16] : memref<1x1xf32, #tpu.memory_space<vmem>>, vector<1x1xf32>
    %21 = vector.broadcast %20 : vector<1x1xf32> to vector<1x128xf32>
    %22 = arith.addf %19, %21 : vector<1x128xf32>
    %c0_17 = arith.constant 0 : index
    %c0_18 = arith.constant 0 : index
    %23 = vector.load %arg8[%c0_17, %c0_18] : memref<1x128xf32, #tpu.memory_space<vmem>>, vector<1x128xf32>
    tpu.vector_store %arg8[%c0_17, %c0_18], %22 {strides = array<i32>} : memref<1x128xf32, #tpu.memory_space<vmem>>, vector<1x128xf32>,
    return
  }
  func.func @transform_0(%arg0: i32) -> (i32, i32) {
    %c0_i32 = arith.constant 0 : i32
    %c0_i32_0 = arith.constant 0 : i32
    return %c0_i32, %arg0 : i32, i32
  }
  func.func @transform_1(%arg0: i32) -> (i32, i32) {
    %c0_i32 = arith.constant 0 : i32
    %c0_i32_0 = arith.constant 0 : i32
    %c0_i32_1 = arith.constant 0 : i32
    return %c0_i32, %c0_i32_0 : i32, i32
  }
  func.func @transform_2(%arg0: i32) -> (i32, i32) {
    %c0_i32 = arith.constant 0 : i32
    %c0_i32_0 = arith.constant 0 : i32
    %c0_i32_1 = arith.constant 0 : i32
    return %c0_i32, %c0_i32_0 : i32, i32
  }
  func.func @transform_3(%arg0: i32) -> (i32, i32) {
    %c0_i32 = arith.constant 0 : i32
    %c0_i32_0 = arith.constant 0 : i32
    %c0_i32_1 = arith.constant 0 : i32
    return %c0_i32, %c0_i32_0 : i32, i32
  }
  func.func @transform_4(%arg0: i32) -> (i32, i32) {
    %c0_i32 = arith.constant 0 : i32
    %c0_i32_0 = arith.constant 0 : i32
    %c0_i32_1 = arith.constant 0 : i32
    return %c0_i32, %c0_i32_0 : i32, i32
  }
  func.func @transform_5(%arg0: i32) -> (i32, i32) {
    %c0_i32 = arith.constant 0 : i32
    %c0_i32_0 = arith.constant 0 : i32
    %c0_i32_1 = arith.constant 0 : i32
    return %c0_i32, %c0_i32_0 : i32, i32
  }
  func.func @transform_6(%arg0: i32) -> (i32, i32) {
    %c0_i32 = arith.constant 0 : i32
    %c0_i32_0 = arith.constant 0 : i32
    %c0_i32_1 = arith.constant 0 : i32
    return %c0_i32, %c0_i32_0 : i32, i32
  }
  func.func @transform_7(%arg0: i32) -> (i32, i32) {
    %c0_i32 = arith.constant 0 : i32
    %c0_i32_0 = arith.constant 0 : i32
    return %c0_i32, %arg0 : i32, i32
  }
}

</mosaic_0001>

<bundles_post_ra>
// kernel: tpu_custom_call.1
= control target key start
LH: loop header
LB: loop body
LE: loop exit
PB: predicated region body
PF: predicated region fallthrough
CT: control target
= control target key end

     0   :  { %s554_s0 = inlined_call_operand.vmem [shape: f32[4,128], index: 0, kind: input, shape index: {}]   ;;  %s555_s1 = inlined_call_operand.vmem [shape: f32[32,4], index: 1, kind: input, shape index: {}]   ;;  %s556_s2 = inlined_call_operand.vmem [shape: f32[32,1], index: 2, kind: input, shape index: {}]   ;;  %s557_s3 = inlined_call_operand.vmem [shape: f32[32,32], index: 3, kind: input, shape index: {}]   ;;  %s558_s4 = inlined_call_operand.vmem [shape: f32[32,1], index: 4, kind: input, shape index: {}]   ;;  %s559_s5 = inlined_call_operand.vmem [shape: f32[32,1], index: 5, kind: input, shape index: {}]   ;;  %s560_s6 = inlined_call_operand.<no memory space> [shape: f32[1,1], index: 6, kind: input, shape index: {}]   ;;  %s561_s7 = inlined_call_operand.hbm [shape: f32[1,128], index: 7, kind: output, shape index: {}]  }
   0x1   :  { %v12_v0 = vstv %s560_s6 }
   0x2   :  { %13 = vst [vmem:[#allocation2] sm:$0x1] %v12_v0 }
   0x3   :  { %v33_v1 = vld [vmem:[%s554_s0] sm:$0xf]  ;;  %vm71_vm0 = vcmask 1043456   ;;  %vm58_vm1 = vcmask 31744   ;;  %v30_v3 = vld [vmem:[%s555_s1 + $0x8] sm:$0xff]  ;;  %v31_v4 = vld [vmem:[%s555_s1 + $0x10] sm:$0xff] }
   0x4   :  { %v29_v2 = vld [vmem:[%s555_s1] sm:$0xff]  ;;  %379 = vmatprep.subr.msk.mxu0 %vm71_vm0, %v33_v1  ;;  %v37_v5 = vld [vmem:[%s556_s2 + $0x18] sm:$0xff]  ;;  %v435_v6 = vmov 0   ;;  %v35_v7 = vld [vmem:[%s556_s2 + $0x8] sm:$0xff] }
   0x5   :  { %381 = vmatprep.mubr.msk.f32.mxu0 %vm58_vm1, %v29_v2  ;;  %380 = vmatpush3.msk.msra.mxu0 %vm71_vm0, %v33_v1  ;;  %v32_v8 = vld [vmem:[%s555_s1 + $0x18] sm:$0xff]  ;;  %v36_v9 = vld [vmem:[%s556_s2 + $0x10] sm:$0xff]  ;;  %v34_v10 = vld [vmem:[%s556_s2] sm:$0xff] }
   0x6   :  { %411 = vset.pattern.permute.xlu0 %v435_v6  ;;  %382 = vmatmul.mubr.msk.f32.vlgmr.msra.gmra.mxu0 %vm58_vm1, %v30_v3 }
   0x7   :  { %55 = vperm.xlu0 %411, %v37_v5   ;;  %384 = vmatprep.mubr.msk.f32.mxu0 %vm58_vm1, %v31_v4 }
   0x8   :  { %412 = vset.pattern.permute.xlu1 %v435_v6 }
   0x9   :  { %45 = vperm.xlu1 %412, %v35_v7  }
   0xa   :  { %14 = vsyncpa [#allocation4], 0  ;;  %385 = vmatmul.mubr.msk.f32.gmra.mxu0 %vm58_vm1, %v32_v8  ;;  %v168_v11 = vld [vmem:[%s558_s4] sm:$0xff]  ;;  %v169_v12 = vld [vmem:[%s558_s4 + $0x8] sm:$0xff]  ;;  %vm192_vm2 = vcmask 261120   ;;  %v337_v2 = vlaneseq }
   0xb   :  { %50 = vperm.xlu0 %411, %v36_v9   ;;  %v170_v13 = vld [vmem:[%s558_s4 + $0x10] sm:$0xff]  ;;  %v171_v14 = vld [vmem:[%s558_s4 + $0x18] sm:$0xff]  ;;  %v294_v15 = vld [vmem:[%s559_s5] sm:$0xff] }
   0xc   :  { %v295_v16 = vld [vmem:[%s559_s5 + $0x8] sm:$0xff]  ;;  %v296_v17 = vld [vmem:[%s559_s5 + $0x10] sm:$0xff]  ;;  %v297_v18 = vld [vmem:[%s559_s5 + $0x18] sm:$0xff]  ;;  %v338_v5 = vshrl.u32 %v337_v2, 7 }
   0xd   :  { %40 = vperm.xlu1 %412, %v34_v10   ;;  %v331_v19 = vld [vmem:[#allocation2] sm:$0x1]  ;;  %v166_v21 = vld [vmem:[%s557_s3 + $0x10] sm:$0xff]  ;;  %v165_v38 = vld [vmem:[%s557_s3 + $0x8] sm:$0xff] }
   0xe   :  { %v164_v20 = vld [vmem:[%s557_s3] sm:$0xff]  ;;  %398 = vmatprep.mubr.msk.f32.mxu1 %vm192_vm2, %v166_v21  ;;  %v167_v39 = vld [vmem:[%s557_s3 + $0x18] sm:$0xff]  ;;  %v339_v8 = vsub.s32 0, %v338_v5  ;;  %s436_s3 = smov [#allocation3]  }
   0xf   :  { %174 = vperm.xlu0 %411, %v168_v11   ;;  %395 = vmatprep.mubr.msk.f32.mxu0 %vm192_vm2, %v164_v20  ;;  %s349_s14 = sshll.u32 %s436_s3, 4  ;;  %s350_s14 = int_to_ptr.vmem [resolvable:$true] %s349_s14 }
  0x10   :  { %s413_s15 = scalar_lea.vmem %s350_s14, 16  ;;  %s417_s16 = scalar_lea.vmem %s350_s14, 32 }
  0x11   :  { %179 = vperm.xlu1 %412, %v169_v12   ;;  %p414_p0 = scmp.ne.s32.totalorder %s350_s14, %s413_s15  ;;  %p418_p1 = scmp.lt.s32.totalorder %s350_s14, %s350_s14 }
  0x12   :  { %p419_p2 = scmp.lt.s32.totalorder %s417_s16, %s413_s15 }
  0x13   :  { %184 = vperm.xlu0 %411, %v170_v13  }
  0x14   :  { %p420_p3 = por %p419_p2, %p418_p1 }
  0x15   :  { %189 = vperm.xlu1 %412, %v171_v14  }
  0x16   :  { %p421_p4 = pnand %p420_p3, %p414_p0 }
  0x17   :  { %300 = vperm.xlu0 %411, %v294_v15  }
  0x19   :  { %305 = vperm.xlu1 %412, %v295_v16  }
  0x1b   :  { %310 = vperm.xlu0 %411, %v296_v17  }
  0x1d   :  { %315 = vperm.xlu1 %412, %v297_v18  }
  0x1f   :  { %334 = vperm.xlu0 %411, %v331_v19  }
  0x82   :  { %v56_v22 = vpop.permute.xlu0 %55 }
  0x84   :  { %v46_v24 = vpop.permute.xlu1 %45 }
  0x86   :  { %v51_v28 = vpop.permute.xlu0 %50 }
  0x88   :  { %v41_v33 = vpop.permute.xlu1 %40 }
  0x8a   :  { %v175_v40 = vpop.permute.xlu0 %174 }
  0x8c   :  { %v180_v41 = vpop.permute.xlu1 %179 }
  0x8e   :  { %v185_v42 = vpop.permute.xlu0 %184 }
  0x90   :  { %v190_v43 = vpop.permute.xlu1 %189 }
  0x92   :  { %v301_v46 = vpop.permute.xlu0 %300 }
  0x94   :  { %v306_v54 = vpop.permute.xlu1 %305 }
  0x96   :  { %v311_v60 = vpop.permute.xlu0 %310 }
  0x98   :  { %v316_v63 = vpop.permute.xlu1 %315 }
  0x9a   :  { %v335_v10 = vpop.permute.xlu0 %334 }
  0x9b   :  { %v340_v12 = vrot.slane %v335_v10, %v339_v8 }
  0xc6   :  { %v383_v23 = vpop.f32.mrf.mxu0 }
  0xc7   :  { %v147_v30 = vadd.f32 %v383_v23, %v46_v24 }
  0xc8   :  { %v141_v25 = vpop.f32.mrf.mxu0 }
  0xc9   :  { %v142_v34 = vadd.f32 %v141_v25, %v41_v33  ;;  %v161_v36 = vmax.f32 %v147_v30, 0.0 }
  0xca   :  { %v386_v26 = vpop.f32.mrf.mxu0 }
  0xcb   :  { %v157_v27 = vadd.f32 %v386_v26, %v56_v22  ;;  %v160_v37 = vmax.f32 %v142_v34, 0.0 }
  0xcc   :  { %v151_v29 = vpop.f32.mrf.mxu0 }
  0xcd   :  { %v163_v31 = vmax.f32 %v157_v27, 0.0  ;;  %v152_v32 = vadd.f32 %v151_v29, %v51_v28 }
  0xcf   :  { %v162_v35 = vmax.f32 %v152_v32, 0.0  ;;  %387 = vmatprep.subr.mxu0 %v163_v31  ;;  %401 = vmatprep.subr.mxu1 %v163_v31 }
  0xd0   :  { %388 = vmatpush3.msra.mxu0 %v163_v31  ;;  %405 = vmatpush3.msra.mxu1 %v163_v31 }
  0xd1   :  { %389 = vmatprep.subr.mxu0 %v162_v35  ;;  %402 = vmatprep.subr.mxu1 %v162_v35 }
  0xd2   :  { %390 = vmatpush3.msra.mxu0 %v162_v35  ;;  %406 = vmatpush3.msra.mxu1 %v162_v35 }
  0xd3   :  { %391 = vmatprep.subr.mxu0 %v161_v36  ;;  %403 = vmatprep.subr.mxu1 %v161_v36 }
  0xd4   :  { %392 = vmatpush3.msra.mxu0 %v161_v36  ;;  %407 = vmatpush3.msra.mxu1 %v161_v36 }
  0xd5   :  { %393 = vmatprep.subr.mxu0 %v160_v37  ;;  %404 = vmatprep.subr.mxu1 %v160_v37 }
  0xd6   :  { %394 = vmatpush3.msra.mxu0 %v160_v37  ;;  %408 = vmatpush3.msra.mxu1 %v160_v37 }
  0xd7   :  { %396 = vmatmul.mubr.msk.f32.vlgmr.msra.gmra.mxu0 %vm192_vm2, %v165_v38  ;;  %399 = vmatmul.mubr.msk.f32.vlgmr.msra.gmra.mxu1 %vm192_vm2, %v167_v39 }
 0x197   :  { %v397_v44 = vpop.f32.mrf.mxu0  ;;  %v400_v45 = vpop.f32.mrf.mxu1 }
 0x198   :  { %v277_v47 = vadd.f32 %v397_v44, %v180_v41  ;;  %v287_v51 = vadd.f32 %v400_v45, %v190_v43 }
 0x199   :  { %v271_v48 = vpop.f32.mrf.mxu0  ;;  %v281_v49 = vpop.f32.mrf.mxu1 }
 0x19a   :  { %v291_v50 = vmax.f32 %v277_v47, 0.0  ;;  %v272_v52 = vadd.f32 %v271_v48, %v175_v40  ;;  %v282_v53 = vadd.f32 %v281_v49, %v185_v42  ;;  %v293_v58 = vmax.f32 %v287_v51, 0.0 }
 0x19c   :  { %v290_v55 = vmax.f32 %v272_v52, 0.0  ;;  %v292_v56 = vmax.f32 %v282_v53, 0.0  ;;  %v319_v57 = vmul.f32 %v306_v54, %v291_v50  ;;  %v321_v0 = vmul.f32 %v316_v63, %v293_v58 }
 0x19e   :  { %v318_v59 = vmul.f32 %v301_v46, %v290_v55  ;;  %v320_v62 = vmul.f32 %v311_v60, %v292_v56 }
 0x1a0   :  { %v322_v61 = vadd.f32 %v319_v57, %v318_v59 }
 0x1a2   :  { %v323_v1 = vadd.f32 %v322_v61, %v320_v62 }
 0x1a4   :  { %v324_v3 = vadd.f32 %v323_v1, %v321_v0 }
 0x1a6   :  { %v325_v4 = vrot.slane %v324_v3, 4 }
 0x1a8   :  { %v326_v6 = vadd.f32 %v325_v4, %v324_v3 }
 0x1aa   :  { %v327_v7 = vrot.slane %v326_v6, 2 }
 0x1ac   :  { %v328_v9 = vadd.f32 %v327_v7, %v326_v6 }
 0x1ae   :  { %v329_v11 = vrot.slane %v328_v9, 1 }
 0x1b0   :  { %v330_v13 = vadd.f32 %v329_v11, %v328_v9 }
 0x1b2   :  { %v341_v14 = vadd.f32 %v340_v12, %v330_v13 }
 0x1b4   :  { %342 = vst [vmem:[#allocation3] sm:$0x1] %v341_v14 }
 0x1b5   :  { %424 = shalt.err (!%p421_p4)
}
 0x1b6   :  { %352 = dma.vmem_to_hbm [thread:$0]  %s350_s14, 16, %s561_s7, [#allocation4]  }
 0x1b7   :  { %433 = dma.done.wait [#allocation4], 16  }
 0x1b8   :  { %434 = vsyncadd [#allocation4], 4294967280 }
 0x1b9   :  { %356 = vsyncpa [#allocation4], 1 }

</bundles_post_ra>
